<compile_context>
chip_gen: v7x
topology: tpu7x:2x2x1
jax: 0.10.0
libtpu: 0.0.40
codegen_flags: <defaults>
</compile_context>

<pallas_src>
import functools

import jax
import jax.numpy as jnp
from jax.experimental import pallas as pl
from jax.experimental.pallas import tpu as pltpu

LANE = 128
SUBLANE = 8
# Conservative budgets that are safe across generations (v7x: 64 MiB physical).
_RESIDENT_BUDGET = 40 * 1024 * 1024   # allow resident weights only below this
_VMEM_SOFT_CAP = 56 * 1024 * 1024     # never ask the compiler for more than this


def _round_up(x, m):
    return (x + m - 1) // m * m


def _fused_mlp_kernel(x_ref, w_in_ref, w_hid_ref, w_out_ref,
                      b_in_ref, b_hid_ref, b_out_ref, o_ref, act_ref, *,
                      num_layers, outermost_linear, resident_hidden):
    """One grid step = one layer applied to one batch tile.

    x_ref:     (BT, Kp)            padded input tile (one DMA per batch tile)
    w_in_ref:  (Kp, Hp)            input-layer weight (loaded once)
    w_hid_ref: (Lh, Hp, Hp) resident  OR  (Hp, Hp) streamed per layer
    w_out_ref: (Hp, Np)            output-layer weight (loaded once)
    b_*_ref:   bias blocks (loaded once; b_hid is (Lh, 1, Hp))
    o_ref:     (BT, Np)            padded output tile (written at last layer)
    act_ref:   (BT, Hp) f32 VMEM   activation carried across the layer axis
    """
    l = pl.program_id(1)
    last = num_layers - 1

    @pl.when(l == 0)
    def _():
        # input layer: act = relu(x @ W_in + b_in)
        lhs = x_ref[...].astype(w_in_ref.dtype)
        y = jnp.dot(lhs, w_in_ref[...], preferred_element_type=jnp.float32)
        act_ref[...] = jnp.maximum(y + b_in_ref[...], 0.0)

    @pl.when(jnp.logical_and(l > 0, l < last))
    def _():
        # hidden layer: act = relu(act @ W_l + b_l) + act   (residual fused)
        a = act_ref[...]
        w = w_hid_ref[l - 1] if resident_hidden else w_hid_ref[...]
        b = b_hid_ref[l - 1]
        y = jnp.dot(a.astype(w.dtype), w, preferred_element_type=jnp.float32)
        act_ref[...] = jnp.maximum(y + b, 0.0) + a

    @pl.when(l == last)
    def _():
        # output layer (+ optional ReLU), lane-dense store of the padded tile
        a = act_ref[...]
        y = jnp.dot(a.astype(w_out_ref.dtype), w_out_ref[...],
                    preferred_element_type=jnp.float32) + b_out_ref[...]
        if not outermost_linear:
            y = jnp.maximum(y, 0.0)
        o_ref[...] = y.astype(o_ref.dtype)


def prepare_mlp_params(params, compute_dtype=jnp.float32):
    """One-time padding / stacking of the weights (hoisted off the hot path).

    Weights are stored pre-transposed as (in, out) so the kernel computes
    y = x @ W + b. Set compute_dtype=jnp.bfloat16 on v6e/v7x for the bf16 MXU
    path (accumulation stays f32; expect ~1e-2 vs an f32 reference).
    """
    w_in, b_in = params["input"]
    w_out, b_out = params["output"]
    hidden = params["hidden"]

    in_f, hid_f = w_in.shape
    out_f = w_out.shape[1]
    assert w_out.shape[0] == hid_f
    for w, b in hidden:
        # residual add requires square hidden layers
        assert w.shape == (hid_f, hid_f) and b.shape == (hid_f,)

    Kp = _round_up(in_f, LANE)
    Hp = _round_up(hid_f, LANE)
    Np = _round_up(out_f, LANE)
    Lh = len(hidden)
    Lhp = max(Lh, 1)

    def pad_w(w, r, c):
        return (jnp.zeros((r, c), compute_dtype)
                .at[: w.shape[0], : w.shape[1]].set(w.astype(compute_dtype)))

    def pad_b(b, c):
        return (jnp.zeros((1, c), jnp.float32)
                .at[0, : b.shape[0]].set(b.astype(jnp.float32)))

    w_in_p = pad_w(w_in, Kp, Hp)
    w_out_p = pad_w(w_out, Hp, Np)
    if Lh:
        w_hid_p = jnp.stack([pad_w(w, Hp, Hp) for w, _ in hidden])   # (Lh,Hp,Hp)
        b_hid_p = jnp.stack([pad_b(b, Hp) for _, b in hidden])       # (Lh,1,Hp)
    else:
        w_hid_p = jnp.zeros((1, Hp, Hp), compute_dtype)
        b_hid_p = jnp.zeros((1, 1, Hp), jnp.float32)

    return dict(
        w_in=w_in_p, w_hid=w_hid_p, w_out=w_out_p,
        b_in=pad_b(b_in, Hp), b_hid=b_hid_p, b_out=pad_b(b_out, Np),
        dims=(in_f, hid_f, out_f, Lh),
    )


def mlp_forward(x, prepared, outermost_linear=False):
    """Fused MLP forward. x: (B, in_features) -> (B, out_features)."""
    w_in_p, w_hid_p, w_out_p = prepared["w_in"], prepared["w_hid"], prepared["w_out"]
    b_in_p, b_hid_p, b_out_p = prepared["b_in"], prepared["b_hid"], prepared["b_out"]
    in_f, hid_f, out_f, Lh = prepared["dims"]

    Kp, Hp = w_in_p.shape
    Np = w_out_p.shape[1]
    Lhp = w_hid_p.shape[0]
    num_layers = Lh + 2
    w_bytes = w_in_p.dtype.itemsize
    x_bytes = x.dtype.itemsize

    B = x.shape[0]
    BT = min(_round_up(B, SUBLANE), 256)
    # v7x megacore: when the batch allows it, make sure the "parallel" batch
    # axis has >= 2 programs so both TensorCores get work.
    if _round_up(B, SUBLANE) > SUBLANE and _round_up(B, BT) // BT < 2:
        BT = _round_up((B + 1) // 2, SUBLANE)
    Bp = _round_up(B, BT)

    # --- VMEM accounting (conservative: count pipeline double-buffers) ---
    def vmem_need(resident):
        need = 2 * BT * Kp * x_bytes                       # x tile
        need += 2 * Kp * Hp * w_bytes                      # input weight
        need += 2 * Hp * Np * w_bytes                      # output weight
        need += 2 * BT * Np * x_bytes                      # output tile
        need += BT * Hp * 4                                # f32 activation scratch
        need += 2 * (Lhp + 2) * SUBLANE * max(Hp, Np) * 4  # biases (sublane padded)
        need += 2 * (Lhp if resident else 1) * Hp * Hp * w_bytes
        return need

    resident_hidden = vmem_need(True) <= _RESIDENT_BUDGET
    vmem_limit = int(min(max(2 * vmem_need(resident_hidden), 32 * 1024 * 1024),
                         _VMEM_SOFT_CAP))

    x_pad = x
    if (Bp, Kp) != (B, in_f):
        x_pad = jnp.zeros((Bp, Kp), x.dtype).at[:B, :in_f].set(x)

    if resident_hidden:
        # Whole hidden weight stack resident in VMEM: one DMA, indexed in-kernel.
        w_hid_spec = pl.BlockSpec((Lhp, Hp, Hp), lambda bi, l: (0, 0, 0))
    else:
        # Stream one hidden layer per grid step; the default 2-deep buffering
        # prefetches layer l+1's weights while the MXU computes layer l.
        # (On v5e, pipeline_mode=pl.Buffered(3) is the knob if DMA stays exposed.)
        w_hid_spec = pl.BlockSpec(
            (pl.Squeezed(), Hp, Hp),
            lambda bi, l: (jnp.clip(l - 1, 0, Lhp - 1), 0, 0),
        )

    kernel = functools.partial(
        _fused_mlp_kernel,
        num_layers=num_layers,
        outermost_linear=outermost_linear,
        resident_hidden=resident_hidden,
    )

    out_pad = pl.pallas_call(
        kernel,
        out_shape=jax.ShapeDtypeStruct((Bp, Np), x.dtype),
        grid_spec=pltpu.PrefetchScalarGridSpec(
            num_scalar_prefetch=0,
            grid=(Bp // BT, num_layers),
            in_specs=[
                # input tile: same block across the layer axis -> one DMA per tile
                pl.BlockSpec((BT, Kp), lambda bi, l: (bi, 0)),
                # input / output layer weights: constant index -> loaded once
                pl.BlockSpec((Kp, Hp), lambda bi, l: (0, 0)),
                w_hid_spec,
                pl.BlockSpec((Hp, Np), lambda bi, l: (0, 0)),
                # biases: tiny constant-index blocks, loaded once
                pl.BlockSpec((1, Hp), lambda bi, l: (0, 0)),
                pl.BlockSpec((Lhp, 1, Hp), lambda bi, l: (0, 0, 0)),
                pl.BlockSpec((1, Np), lambda bi, l: (0, 0)),
            ],
            out_specs=pl.BlockSpec((BT, Np), lambda bi, l: (bi, 0)),
            scratch_shapes=[pltpu.VMEM((BT, Hp), jnp.float32)],
        ),
        compiler_params=pltpu.CompilerParams(
            dimension_semantics=("parallel", "arbitrary"),
            vmem_limit_bytes=vmem_limit,
        ),
    )(x_pad, w_in_p, w_hid_p, w_out_p, b_in_p, b_hid_p, b_out_p)

    if (Bp, Np) != (B, out_f):
        return out_pad[:B, :out_f]
    return out_pad


def init_mlp_params(key, in_features, hidden_features, hidden_layers, out_features):
    """Deterministic synthetic params. Weights stored as (in, out)."""
    keys = jax.random.split(key, 2 * (hidden_layers + 2))
    params = {}
    k = iter(keys)
    params["input"] = (
        jax.random.normal(next(k), (in_features, hidden_features), jnp.float32) * 0.1,
        jax.random.normal(next(k), (hidden_features,), jnp.float32) * 0.1,
    )
    params["hidden"] = []
    for _ in range(hidden_layers):
        params["hidden"].append((
            jax.random.normal(next(k), (hidden_features, hidden_features), jnp.float32) * 0.1,
            jax.random.normal(next(k), (hidden_features,), jnp.float32) * 0.1,
        ))
    params["output"] = (
        jax.random.normal(next(k), (hidden_features, out_features), jnp.float32) * 0.1,
        jax.random.normal(next(k), (out_features,), jnp.float32) * 0.1,
    )
    return params


def mlp_reference(x, params, outermost_linear=False):
    """Pure-JAX reference for correctness checking."""
    w, b = params["input"]
    x = jnp.maximum(x @ w + b, 0.0)
    for w, b in params["hidden"]:
        x = jnp.maximum(x @ w + b, 0.0) + x
    w, b = params["output"]
    x = x @ w + b
    if not outermost_linear:
        x = jnp.maximum(x, 0.0)
    return x


if __name__ == "__main__":
    in_features = 16
    hidden_features = 32
    hidden_layers = 2
    out_features = 16
    batch = 8

    key = jax.random.PRNGKey(0)
    kx, kp = jax.random.split(key)
    x = jax.random.normal(kx, (batch, in_features), jnp.float32)
    params = init_mlp_params(kp, in_features, hidden_features, hidden_layers, out_features)

    # One-time preparation (padding / stacking / optional bf16 cast), hoisted
    # out of the per-call forward path. f32 here so we match the reference 1e-5.
    prepared = prepare_mlp_params(params, compute_dtype=jnp.float32)

    out = mlp_forward(x, prepared, outermost_linear=False)
    out = jax.block_until_ready(out)

    ref = mlp_reference(x, params, outermost_linear=False)
    assert out.shape == (batch, out_features)
    assert jnp.allclose(out, ref, atol=1e-5, rtol=1e-5), "mismatch vs reference"

    print("KERNEL_OK")
</pallas_src>

<mosaic_0001>
module attributes {stable_mosaic.version = 11 : i64} {
  func.func @_fused_mlp_kernel(%arg0: i32, %arg1: i32, %arg2: memref<8x128xf32, #tpu.memory_space<vmem>>, %arg3: memref<128x128xf32, #tpu.memory_space<vmem>>, %arg4: memref<2x128x128xf32, #tpu.memory_space<vmem>>, %arg5: memref<128x128xf32, #tpu.memory_space<vmem>>, %arg6: memref<1x128xf32, #tpu.memory_space<vmem>>, %arg7: memref<2x1x128xf32, #tpu.memory_space<vmem>>, %arg8: memref<1x128xf32, #tpu.memory_space<vmem>>, %arg9: memref<8x128xf32, #tpu.memory_space<vmem>>, %arg10: memref<8x128xf32, #tpu.memory_space<vmem>>) attributes {dimension_semantics = [#tpu.dimension_semantics<parallel>, #tpu.dimension_semantics<arbitrary>], iteration_bounds = array<i64: 1, 4>, scalar_prefetch = 0 : i64, scratch_operands = 1 : i64, tpu.core_type = #tpu.core_type<tc>, window_params = [{transform_indices = @transform_0, window_bounds = array<i64: 8, 128>}, {pipeline_mode = #tpu.pipeline_mode<synchronous>, transform_indices = @transform_1, window_bounds = array<i64: 128, 128>}, {pipeline_mode = #tpu.pipeline_mode<synchronous>, transform_indices = @transform_2, window_bounds = array<i64: 2, 128, 128>}, {pipeline_mode = #tpu.pipeline_mode<synchronous>, transform_indices = @transform_3, window_bounds = array<i64: 128, 128>}, {pipeline_mode = #tpu.pipeline_mode<synchronous>, transform_indices = @transform_4, window_bounds = array<i64: 1, 128>}, {pipeline_mode = #tpu.pipeline_mode<synchronous>, transform_indices = @transform_5, window_bounds = array<i64: 2, 1, 128>}, {pipeline_mode = #tpu.pipeline_mode<synchronous>, transform_indices = @transform_6, window_bounds = array<i64: 1, 128>}, {transform_indices = @transform_7, window_bounds = array<i64: 8, 128>}]} {
    %c0_i32 = arith.constant 0 : i32
    %0 = arith.cmpi eq, %arg1, %c0_i32 : i32
    %1 = arith.extui %0 : i1 to i32
    %c0_i32_0 = arith.constant 0 : i32
    %2 = arith.cmpi ne, %1, %c0_i32_0 : i32
    scf.if %2 {
      %c0 = arith.constant 0 : index
      %c0_5 = arith.constant 0 : index
      %11 = vector.load %arg2[%c0, %c0_5] : memref<8x128xf32, #tpu.memory_space<vmem>>, vector<8x128xf32>
      %c0_6 = arith.constant 0 : index
      %c0_7 = arith.constant 0 : index
      %12 = vector.load %arg3[%c0_6, %c0_7] : memref<128x128xf32, #tpu.memory_space<vmem>>, vector<128x128xf32>
      %cst = arith.constant dense<0.000000e+00> : vector<8x128xf32>
      %13 = tpu.matmul %11, %12, %cst {dimension_numbers = #tpu.dot_dimension_numbers<[1], [0], [0], [1], [0, 0, 1, 1], [], []>} : vector<8x128xf32>, vector<128x128xf32>, vector<8x128xf32> -> vector<8x128xf32>
      %c0_8 = arith.constant 0 : index
      %c0_9 = arith.constant 0 : index
      %14 = vector.load %arg6[%c0_8, %c0_9] : memref<1x128xf32, #tpu.memory_space<vmem>>, vector<1x128xf32>
      %15 = vector.broadcast %14 : vector<1x128xf32> to vector<8x128xf32>
      %16 = arith.addf %13, %15 : vector<8x128xf32>
      %cst_10 = arith.constant 0.000000e+00 : f32
      %17 = vector.broadcast %cst_10 : f32 to vector<8x128xf32>
      %18 = arith.maximumf %16, %17 : vector<8x128xf32>
      %c0_11 = arith.constant 0 : index
      %c0_12 = arith.constant 0 : index
      %19 = vector.load %arg10[%c0_11, %c0_12] : memref<8x128xf32, #tpu.memory_space<vmem>>, vector<8x128xf32>
      tpu.vector_store %arg10[%c0_11, %c0_12], %18 {strides = array<i32>} : memref<8x128xf32, #tpu.memory_space<vmem>>, vector<8x128xf32>,
    } else {
    }
    %c0_i32_1 = arith.constant 0 : i32
    %3 = arith.cmpi sgt, %arg1, %c0_i32_1 : i32
    %c3_i32 = arith.constant 3 : i32
    %4 = arith.cmpi slt, %arg1, %c3_i32 : i32
    %5 = arith.andi %3, %4 : i1
    %6 = arith.extui %5 : i1 to i32
    %c0_i32_2 = arith.constant 0 : i32
    %7 = arith.cmpi ne, %6, %c0_i32_2 : i32
    scf.if %7 {
      %c0 = arith.constant 0 : index
      %c0_5 = arith.constant 0 : index
      %11 = vector.load %arg10[%c0, %c0_5] : memref<8x128xf32, #tpu.memory_space<vmem>>, vector<8x128xf32>
      %c1_i32 = arith.constant 1 : i32
      %12 = arith.subi %arg1, %c1_i32 : i32
      %13 = arith.index_cast %12 : i32 to index
      %c0_6 = arith.constant 0 : index
      %c0_7 = arith.constant 0 : index
      %14 = vector.load %arg4[%13, %c0_6, %c0_7] : memref<2x128x128xf32, #tpu.memory_space<vmem>>, vector<1x128x128xf32>
      %15 = vector.shape_cast %14 : vector<1x128x128xf32> to vector<128x128xf32>
      %c1_i32_8 = arith.constant 1 : i32
      %16 = arith.subi %arg1, %c1_i32_8 : i32
      %17 = arith.index_cast %16 : i32 to index
      %c0_9 = arith.constant 0 : index
      %c0_10 = arith.constant 0 : index
      %18 = vector.load %arg7[%17, %c0_9, %c0_10] : memref<2x1x128xf32, #tpu.memory_space<vmem>>, vector<1x1x128xf32>
      %19 = vector.shape_cast %18 : vector<1x1x128xf32> to vector<1x128xf32>
      %cst = arith.constant dense<0.000000e+00> : vector<8x128xf32>
      %20 = tpu.matmul %11, %15, %cst {dimension_numbers = #tpu.dot_dimension_numbers<[1], [0], [0], [1], [0, 0, 1, 1], [], []>} : vector<8x128xf32>, vector<128x128xf32>, vector<8x128xf32> -> vector<8x128xf32>
      %21 = vector.broadcast %19 : vector<1x128xf32> to vector<8x128xf32>
      %22 = arith.addf %20, %21 : vector<8x128xf32>
      %cst_11 = arith.constant 0.000000e+00 : f32
      %23 = vector.broadcast %cst_11 : f32 to vector<8x128xf32>
      %24 = arith.maximumf %22, %23 : vector<8x128xf32>
      %25 = arith.addf %24, %11 : vector<8x128xf32>
      %c0_12 = arith.constant 0 : index
      %c0_13 = arith.constant 0 : index
      %26 = vector.load %arg10[%c0_12, %c0_13] : memref<8x128xf32, #tpu.memory_space<vmem>>, vector<8x128xf32>
      tpu.vector_store %arg10[%c0_12, %c0_13], %25 {strides = array<i32>} : memref<8x128xf32, #tpu.memory_space<vmem>>, vector<8x128xf32>,
    } else {
    }
    %c3_i32_3 = arith.constant 3 : i32
    %8 = arith.cmpi eq, %arg1, %c3_i32_3 : i32
    %9 = arith.extui %8 : i1 to i32
    %c0_i32_4 = arith.constant 0 : i32
    %10 = arith.cmpi ne, %9, %c0_i32_4 : i32
    scf.if %10 {
      %c0 = arith.constant 0 : index
      %c0_5 = arith.constant 0 : index
      %11 = vector.load %arg10[%c0, %c0_5] : memref<8x128xf32, #tpu.memory_space<vmem>>, vector<8x128xf32>
      %c0_6 = arith.constant 0 : index
      %c0_7 = arith.constant 0 : index
      %12 = vector.load %arg5[%c0_6, %c0_7] : memref<128x128xf32, #tpu.memory_space<vmem>>, vector<128x128xf32>
      %cst = arith.constant dense<0.000000e+00> : vector<8x128xf32>
      %13 = tpu.matmul %11, %12, %cst {dimension_numbers = #tpu.dot_dimension_numbers<[1], [0], [0], [1], [0, 0, 1, 1], [], []>} : vector<8x128xf32>, vector<128x128xf32>, vector<8x128xf32> -> vector<8x128xf32>
      %c0_8 = arith.constant 0 : index
      %c0_9 = arith.constant 0 : index
      %14 = vector.load %arg8[%c0_8, %c0_9] : memref<1x128xf32, #tpu.memory_space<vmem>>, vector<1x128xf32>
      %15 = vector.broadcast %14 : vector<1x128xf32> to vector<8x128xf32>
      %16 = arith.addf %13, %15 : vector<8x128xf32>
      %cst_10 = arith.constant 0.000000e+00 : f32
      %17 = vector.broadcast %cst_10 : f32 to vector<8x128xf32>
      %18 = arith.maximumf %16, %17 : vector<8x128xf32>
      %c0_11 = arith.constant 0 : index
      %c0_12 = arith.constant 0 : index
      %19 = vector.load %arg9[%c0_11, %c0_12] : memref<8x128xf32, #tpu.memory_space<vmem>>, vector<8x128xf32>
      tpu.vector_store %arg9[%c0_11, %c0_12], %18 {strides = array<i32>} : memref<8x128xf32, #tpu.memory_space<vmem>>, vector<8x128xf32>,
    } else {
    }
    return
  }
  func.func @transform_0(%arg0: i32, %arg1: i32) -> (i32, i32) {
    %c0_i32 = arith.constant 0 : i32
    %c0_i32_0 = arith.constant 0 : i32
    return %arg0, %c0_i32 : i32, i32
  }
  func.func @transform_1(%arg0: i32, %arg1: i32) -> (i32, i32) {
    %c0_i32 = arith.constant 0 : i32
    %c0_i32_0 = arith.constant 0 : i32
    %c0_i32_1 = arith.constant 0 : i32
    return %c0_i32, %c0_i32_0 : i32, i32
  }
  func.func @transform_2(%arg0: i32, %arg1: i32) -> (i32, i32, i32) {
    %c0_i32 = arith.constant 0 : i32
    %c0_i32_0 = arith.constant 0 : i32
    %c0_i32_1 = arith.constant 0 : i32
    %c0_i32_2 = arith.constant 0 : i32
    return %c0_i32, %c0_i32_0, %c0_i32_1 : i32, i32, i32
  }
  func.func @transform_3(%arg0: i32, %arg1: i32) -> (i32, i32) {
    %c0_i32 = arith.constant 0 : i32
    %c0_i32_0 = arith.constant 0 : i32
    %c0_i32_1 = arith.constant 0 : i32
    return %c0_i32, %c0_i32_0 : i32, i32
  }
  func.func @transform_4(%arg0: i32, %arg1: i32) -> (i32, i32) {
    %c0_i32 = arith.constant 0 : i32
    %c0_i32_0 = arith.constant 0 : i32
    %c0_i32_1 = arith.constant 0 : i32
    return %c0_i32, %c0_i32_0 : i32, i32
  }
  func.func @transform_5(%arg0: i32, %arg1: i32) -> (i32, i32, i32) {
    %c0_i32 = arith.constant 0 : i32
    %c0_i32_0 = arith.constant 0 : i32
    %c0_i32_1 = arith.constant 0 : i32
    %c0_i32_2 = arith.constant 0 : i32
    return %c0_i32, %c0_i32_0, %c0_i32_1 : i32, i32, i32
  }
  func.func @transform_6(%arg0: i32, %arg1: i32) -> (i32, i32) {
    %c0_i32 = arith.constant 0 : i32
    %c0_i32_0 = arith.constant 0 : i32
    %c0_i32_1 = arith.constant 0 : i32
    return %c0_i32, %c0_i32_0 : i32, i32
  }
  func.func @transform_7(%arg0: i32, %arg1: i32) -> (i32, i32) {
    %c0_i32 = arith.constant 0 : i32
    %c0_i32_0 = arith.constant 0 : i32
    return %arg0, %c0_i32 : i32, i32
  }
}

</mosaic_0001>

<bundles_post_ra>
// kernel: tpu_custom_call.1
= control target key start
LH: loop header
LB: loop body
LE: loop exit
PB: predicated region body
PF: predicated region fallthrough
CT: control target
= control target key end

     0   :  { %12 = vsyncpa [#allocation4], 0  ;;  %s1519_s0 = inlined_call_operand.hbm [shape: f32[8,128], index: 0, kind: input, shape index: {}]   ;;  %s1520_s1 = inlined_call_operand.hbm [shape: f32[128,128], index: 1, kind: input, shape index: {}]   ;;  %s1521_s2 = inlined_call_operand.hbm [shape: f32[2,128,128], index: 2, kind: input, shape index: {}]   ;;  %s1522_s3 = inlined_call_operand.hbm [shape: f32[128,128], index: 3, kind: input, shape index: {}]   ;;  %s1523_s4 = inlined_call_operand.vmem [shape: f32[1,128], index: 4, kind: input, shape index: {}]   ;;  %s1524_s5 = inlined_call_operand.vmem [shape: f32[2,1,128], index: 5, kind: input, shape index: {}]   ;;  %s1525_s6 = inlined_call_operand.vmem [shape: f32[1,128], index: 6, kind: input, shape index: {}]   ;;  %s1526_s7 = inlined_call_operand.hbm [shape: f32[8,128], index: 7, kind: output, shape index: {}]  }
   0x1   :  { %13 = vsyncpa [#allocation7], 0 }
   0x2   :  { %14 = vsyncpa [#allocation10], 0 }
   0x3   :  { %15 = vsyncpa [#allocation5], 0  ;;  %s1293_s24 = smov 0   ;;  %s1295_s25 = smov 0  }
   0x4   :  { %s1297_s26 = smov 0  }
   0x5 LB: > { %s1237_s27 = smov [#allocation6]   ;;  %s1530_s29 = sadd.s32 4294967295, %s1235_s26   ;;  %s1235_s26 = sphi %s1297_s26, %s21_s26   ;;  %s1231_s25 = sphi %s1295_s25, %s1541_s25   ;;  %s1227_s24 = sphi %s1293_s24, %s1540_s24  }
   0x6   : > { %s241_s28 = sshll.u32 %s1237_s27, 4  ;;  %p727_p0 = scmp.ge.s32.totalorder %s1235_s26, 1  ;;  %s1317_s28 = int_to_ptr.vmem [resolvable:$true] %s241_s28 }
   0x7   : > { %p216_p1 = scmp.lt.s32.totalorder %s1235_s26, 5  ;;  %p1313_p2 = scmp.eq.s32.totalorder %s1530_s29, 0 }
   0x8   : > { %s30_s10 = sadd.s32 1, %s1231_s25  ;;  %s1238_s12 = smov [#allocation3]  }
   0x9   : > { %s1531_s30 = scalar_select %p1313_p2, 1, 0 }
   0xa   : > { %p1319_p3 = pnand %p727_p0, %p216_p1  ;;  %p1332_p6 = scmp.ge.s32.totalorder %s30_s10, 4 }
   0xb   : > { %s231_s13 = sshll.u32 %s1238_s12, 4  ;;  %s1059_s16 = scalar_lea.hbm %s1520_s1, 2048  ;;  %s232_s13 = int_to_ptr.vmem [resolvable:$true] %s231_s13 }
   0xc   : > { %s1532_s8 = scalar_select %p1319_p3, 1, 0 }
   0xd   : > { %p996_p4 = pneg %p1319_p3  ;;  %p1060_p7 = scmp.ne.s32.totalorder %s1520_s1, %s1059_s16 }
   0xe   : > { %p1066_p11 = scmp.lt.u32.totalorder %s1059_s16, %s1520_s1 }
   0xf   : > { %p1327_p5 = pnand %p1313_p2, %p996_p4 }
  0x11   : > { %p1344_p8 = pneg %p1327_p5 }
  0x13   : > { %p1062_p9 = pnand %p1344_p8, %p1060_p7 }
  0x15   : > { %p1063_p10 = pneg %p1062_p9 }
  0x17   : > { %p1068_p12 = pnand %p1066_p11, %p1063_p10 }
  0x19   : > { %1071 = shalt.err (!%p1068_p12)
}
  0x1a   : > { %s1072_s22 = scalar_lea.vmem %s1317_s28, 2048  ;;  %p1080_p4 = scmp.lt.s32.totalorder %s1317_s28, %s1317_s28 }
  0x1b   : > { %p1073_p13 = scmp.ne.s32.totalorder %s1317_s28, %s1072_s22  ;;  %p1081_p2 = scmp.lt.s32.totalorder %s1072_s22, %s1072_s22 }
  0x1d   : > { %p1075_p0 = pnand %p1073_p13, %p1344_p8  ;;  %p1082_p7 = por %p1081_p2, %p1080_p4 }
  0x1f   : > { %p1076_p1 = pneg %p1075_p0 }
  0x21   : > { %p1083_p9 = pnand %p1082_p7, %p1076_p1 }
  0x23   : > { %1086 = shalt.err (!%p1083_p9)
}
  0x24   : > { %s1239_s23 = smov 128   ;;  %s1240_s27 = smov 8  }
  0x25   : > { %1002 = dma.hbm_to_vmem [thread:$0]  (!%p1327_p5), %s1520_s1, 2048, %s1317_s28, [#allocation7], %s1239_s23, %s1239_s23, %s1240_s27  }
  0x26   : > { %s1543_s10 = smov (%p1332_p6, %s30_s10), 0  ;;  %s1087_s17 = scalar_lea.hbm %s1519_s0, 128 }
  0x27   : > { %p1088_p2 = scmp.ne.s32.totalorder %s1519_s0, %s1087_s17  ;;  %p1094_p12 = scmp.lt.u32.totalorder %s1087_s17, %s1519_s0 }
  0x29   : > { %p1090_p10 = pnand %p1088_p2, %p1344_p8 }
  0x2b   : > { %p1091_p11 = pneg %p1090_p10 }
  0x2d   : > { %p1096_p13 = pnand %p1094_p12, %p1091_p11 }
  0x2f   : > { %1099 = shalt.err (!%p1096_p13)
}
  0x30   : > { %s1100_s28 = scalar_lea.vmem %s232_s13, 128  ;;  %p1108_p4 = scmp.lt.s32.totalorder %s232_s13, %s232_s13 }
  0x31   : > { %p1101_p6 = scmp.ne.s32.totalorder %s232_s13, %s1100_s28  ;;  %p1109_p7 = scmp.lt.s32.totalorder %s1100_s28, %s1100_s28 }
  0x33   : > { %p1103_p0 = pnand %p1101_p6, %p1344_p8  ;;  %p1110_p9 = por %p1109_p7, %p1108_p4 }
  0x35   : > { %p1104_p1 = pneg %p1103_p0 }
  0x37   : > { %p1111_p3 = pnand %p1110_p9, %p1104_p1 }
  0x39   : > { %1114 = shalt.err (!%p1111_p3)
}
  0x3a   : > { %999 = dma.hbm_to_vmem [thread:$0]  (!%p1327_p5), %s1519_s0, 128, %s232_s13, [#allocation4]  }
  0x3b   : > { %s1241_s14 = smov [#allocation8]   ;;  %s1242_s16 = smov [#allocation9]  }
  0x3c   : > { %s254_s15 = sshll.u32 %s1241_s14, 4  ;;  %s267_s17 = sshll.u32 %s1242_s16, 4  ;;  %s255_s15 = int_to_ptr.vmem [resolvable:$true] %s254_s15  ;;  %s268_s17 = int_to_ptr.vmem [resolvable:$true] %s267_s17 }
  0x3d   : > { %s1115_s21 = scalar_lea.hbm %s1521_s2, 4096 }
  0x3e   : > { %p1116_p3 = scmp.ne.s32.totalorder %s1521_s2, %s1115_s21  ;;  %p1122_p11 = scmp.lt.u32.totalorder %s1115_s21, %s1521_s2 }
  0x40   : > { %p1118_p2 = pnand %p1116_p3, %p1344_p8 }
  0x42   : > { %p1119_p10 = pneg %p1118_p2 }
  0x44   : > { %p1124_p12 = pnand %p1122_p11, %p1119_p10 }
  0x46   : > { %1127 = shalt.err (!%p1124_p12)
}
  0x47   : > { %s1128_s13 = scalar_lea.vmem %s255_s15, 4096  ;;  %p1136_p1 = scmp.lt.s32.totalorder %s255_s15, %s255_s15 }
  0x48   : > { %p1129_p13 = scmp.ne.s32.totalorder %s255_s15, %s1128_s13  ;;  %p1137_p4 = scmp.lt.s32.totalorder %s1128_s13, %s1128_s13 }
  0x4a   : > { %p1131_p6 = pnand %p1129_p13, %p1344_p8  ;;  %p1138_p7 = por %p1137_p4, %p1136_p1 }
  0x4c   : > { %p1132_p0 = pneg %p1131_p6 }
  0x4e   : > { %p1139_p9 = pnand %p1138_p7, %p1132_p0 }
  0x50   : > { %1142 = shalt.err (!%p1139_p9)
}
  0x51   : > { %1005 = dma.hbm_to_vmem [thread:$0]  (!%p1327_p5), %s1521_s2, 4096, %s255_s15, [#allocation7], %s1239_s23, %s1239_s23, %s1240_s27  }
  0x52   : > { %s1143_s18 = scalar_lea.hbm %s1522_s3, 2048 }
  0x53   : > { %p1144_p3 = scmp.ne.s32.totalorder %s1522_s3, %s1143_s18  ;;  %p1150_p11 = scmp.lt.u32.totalorder %s1143_s18, %s1522_s3 }
  0x55   : > { %p1146_p2 = pnand %p1144_p3, %p1344_p8 }
  0x57   : > { %p1147_p10 = pneg %p1146_p2 }
  0x59   : > { %p1152_p12 = pnand %p1150_p11, %p1147_p10 }
  0x5b   : > { %1155 = shalt.err (!%p1152_p12)
}
  0x5c   : > { %s1156_s11 = scalar_lea.vmem %s268_s17, 2048  ;;  %p1164_p1 = scmp.lt.s32.totalorder %s268_s17, %s268_s17 }
  0x5d   : > { %p1157_p13 = scmp.ne.s32.totalorder %s268_s17, %s1156_s11  ;;  %p1165_p4 = scmp.lt.s32.totalorder %s1156_s11, %s1156_s11 }
  0x5f   : > { %p1159_p6 = pnand %p1157_p13, %p1344_p8  ;;  %p1166_p7 = por %p1165_p4, %p1164_p1 }
  0x61   : > { %p1160_p0 = pneg %p1159_p6 }
  0x63   : > { %p1167_p9 = pnand %p1166_p7, %p1160_p0 }
  0x65   : > { %1170 = shalt.err (!%p1167_p9)
}
  0x66   : > { %1008 = dma.hbm_to_vmem [thread:$0]  (!%p1327_p5), %s1522_s3, 2048, %s268_s17, [#allocation10], %s1239_s23, %s1239_s23, %s1240_s27  }
  0x67   : > { %p1536_p3 = scmp.ne.s32.totalorder %s1532_s8, 0 }
  0x68   : > { %p1537_p8 = scmp.ne.s32.totalorder (!%p1536_p3), %s1531_s30, 0 }
  0x69   : > { %292 = sbr.rel (%p1536_p3) target bundleno = 905 (0x389), region = 48 }
  0x70   : > { %1210 = dma.done.wait (%p1537_p8), [#allocation4], 128  }
  0x71   : > { %1212 = vsyncadd (%p1537_p8), [#allocation4], 4294967168 }
  0x72   : > { %1214 = dma.done.wait (%p1537_p8), [#allocation7], 6144  }
  0x73   : > { %1216 = vsyncadd (%p1537_p8), [#allocation7], 4294961152 }
  0x74   : > { %1218 = dma.done.wait (%p1537_p8), [#allocation10], 2048  }
  0x75   : > { %1220 = vsyncadd (%p1537_p8), [#allocation10], 4294965248  ;;  %p737_p5 = scmp.ne.s32.totalorder %s1227_s24, 0 }
  0x76   : > { %v331_v0 = vld [vmem:[#allocation6] sm:$0xff] (!%p737_p5)  ;;  %v332_v1 = vld [vmem:[#allocation6 + $0x8] sm:$0xff] (!%p737_p5)  ;;  %v333_v2 = vld [vmem:[#allocation6 + $0x10] sm:$0xff] (!%p737_p5)  ;;  %v1243_v3 = vmov (!%p737_p5), 0.0|0.0   ;;  %vm1244_vm0 = vmmov (!%p737_p5), 0   ;;  %v1245_v6 = vmov (!%p737_p5), 0.0  }
  0x77   : > { %329 = sbr.rel (%p737_p5) target bundleno = 369 (0x171), region = 68  ;;  %904 = vmatprep.subr.bf16.mxu0 (!%p737_p5), %v1243_v3  ;;  %v905_v4 = vpack.c.bf16 (!%p737_p5), %v332_v1, %v331_v0  ;;  %v334_v5 = vld [vmem:[#allocation6 + $0x18] sm:$0xff] (!%p737_p5)  ;;  %831 = vmatprep.mubr.msk.f32.mxu0 (!%p737_p5), %vm1244_vm0, %v1245_v6  ;;  %v335_v8 = vld [vmem:[#allocation6 + $0x20] sm:$0xff] (!%p737_p5)  ;;  %v336_v9 = vld [vmem:[#allocation6 + $0x28] sm:$0xff] (!%p737_p5) }
  0x78   : > { %v908_v7 = vpack.c.bf16 (!%p737_p5), %v334_v5, %v333_v2  ;;  %v911_v10 = vpack.c.bf16 (!%p737_p5), %v336_v9, %v335_v8  ;;  %v337_v11 = vld [vmem:[#allocation6 + $0x30] sm:$0xff] (!%p737_p5)  ;;  %v338_v12 = vld [vmem:[#allocation6 + $0x38] sm:$0xff] (!%p737_p5)  ;;  %v339_v14 = vld [vmem:[#allocation6 + $0x40] sm:$0xff] (!%p737_p5) }
  0x79   : > { %906 = vmatpush3.bf16.msra.mxu0 (!%p737_p5), %v905_v4  ;;  %v914_v13 = vpack.c.bf16 (!%p737_p5), %v338_v12, %v337_v11  ;;  %v340_v15 = vld [vmem:[#allocation6 + $0x48] sm:$0xff] (!%p737_p5)  ;;  %v341_v17 = vld [vmem:[#allocation6 + $0x50] sm:$0xff] (!%p737_p5)  ;;  %v342_v18 = vld [vmem:[#allocation6 + $0x58] sm:$0xff] (!%p737_p5) }
  0x7a   : > { %907 = vmatprep.subr.bf16.mxu0 (!%p737_p5), %v1243_v3  ;;  %v917_v16 = vpack.c.bf16 (!%p737_p5), %v340_v15, %v339_v14  ;;  %v920_v19 = vpack.c.bf16 (!%p737_p5), %v342_v18, %v341_v17  ;;  %v343_v20 = vld [vmem:[#allocation6 + $0x60] sm:$0xff] (!%p737_p5)  ;;  %v344_v21 = vld [vmem:[#allocation6 + $0x68] sm:$0xff] (!%p737_p5)  ;;  %v345_v23 = vld [vmem:[#allocation6 + $0x70] sm:$0xff] (!%p737_p5) }
  0x7b   : > { %v923_v22 = vpack.c.bf16 (!%p737_p5), %v344_v21, %v343_v20  ;;  %v346_v24 = vld [vmem:[#allocation6 + $0x78] sm:$0xff] (!%p737_p5)  ;;  %v738_v27 = vld [vmem:[%s1523_s4] ss:$0 sm:$0xff] (!%p737_p5) }
  0x7c   : > { %v926_v25 = vpack.c.bf16 (!%p737_p5), %v346_v24, %v345_v23  ;;  %v330_v26 = vld [vmem:[#allocation3] sm:$0xff] (!%p737_p5) }
  0x7d   : > { %909 = vmatpush3.bf16.msra.mxu0 (!%p737_p5), %v908_v7 }
  0x7e   : > { %910 = vmatprep.subr.bf16.mxu0 %v1243_v3 }
  0x81   : > { %912 = vmatpush3.bf16.msra.mxu0 %v911_v10 }
  0x82   : > { %913 = vmatprep.subr.bf16.mxu0 %v1243_v3 }
  0x85   : > { %915 = vmatpush3.bf16.msra.mxu0 %v914_v13 }
  0x86   : > { %916 = vmatprep.subr.bf16.mxu0 %v1243_v3 }
  0x89   : > { %918 = vmatpush3.bf16.msra.mxu0 %v917_v16 }
  0x8a   : > { %919 = vmatprep.subr.bf16.mxu0 %v1243_v3 }
  0x8d   : > { %921 = vmatpush3.bf16.msra.mxu0 %v920_v19 }
  0x8e   : > { %922 = vmatprep.subr.bf16.mxu0 %v1243_v3 }
  0x91   : > { %924 = vmatpush3.bf16.msra.mxu0 %v923_v22 }
  0x92   : > { %925 = vmatprep.subr.bf16.mxu0 %v1243_v3 }
  0x95   : > { %927 = vmatpush3.bf16.msra.mxu0 %v926_v25 }
  0x98   : > { %832 = vmatmul.mubr.f32.vlgmr.msra.gmra.mrb[0].mxu0 %v330_v26 }
 0x16b   : > { %v420_v28 = vpop.f32.mrb[0].mxu0 }
 0x16c   : > { %v421_v29 = vadd.f32 %v738_v27, %v420_v28  ;;  %v833_v30 = vpop.f32.mrb[1].mxu0 }
 0x16e   : > { %v424_v31 = vmax.f32 %v421_v29, 0.0 }
 0x170   : > { %425 = vst [vmem:[#allocation2] sm:$0xff] %v424_v31 }
 0x171 PF: > { %p426_p2 = scmp.gt.s32.totalorder %s1227_s24, 0  ;;  %p427_p10 = scmp.lt.s32.totalorder %s1227_s24, 3 }
 0x173   : > { %p428_p11 = pnand %p427_p10, %p426_p2 }
 0x174   : > { %s739_s9 = sadd.s32 (!%p428_p11), 4294967295, %s1227_s24  ;;  %v1246_v32 = vmov (!%p428_p11), 0.0|0.0   ;;  %vm1247_vm1 = vmmov (!%p428_p11), 0   ;;  %v1248_v33 = vmov (!%p428_p11), 0.0  }
 0x175   : > { %431 = sbr.rel (%p428_p11) target bundleno = 628 (0x274), region = 72  ;;  %928 = vmatprep.subr.bf16.mxu0 (!%p428_p11), %v1246_v32  ;;  %s740_s19 = sshll.u32 (!%p428_p11), %s739_s9, 7  ;;  %866 = vmatprep.mubr.msk.f32.mxu0 (!%p428_p11), %vm1247_vm1, %v1248_v33 }
 0x176   : > { %s1455_s23 = scalar_lea.vmem (!%p428_p11), [#allocation8], %s740_s19  ;;  %s452_s29 = scalar_lea.vmem (!%p428_p11), %s1524_s5, %s739_s9 }
 0x177   : > { %v436_v34 = vld [vmem:[%s1455_s23] sm:$0xff] (!%p428_p11)  ;;  %v437_v35 = vld [vmem:[%s1455_s23 + $0x8] sm:$0xff] (!%p428_p11)  ;;  %v438_v36 = vld [vmem:[%s1455_s23 + $0x10] sm:$0xff] (!%p428_p11) }
 0x178   : > { %v929_v37 = vpack.c.bf16 (!%p428_p11), %v437_v35, %v436_v34  ;;  %v439_v38 = vld [vmem:[%s1455_s23 + $0x18] sm:$0xff] (!%p428_p11)  ;;  %v440_v40 = vld [vmem:[%s1455_s23 + $0x20] sm:$0xff] (!%p428_p11)  ;;  %v441_v41 = vld [vmem:[%s1455_s23 + $0x28] sm:$0xff] (!%p428_p11) }
 0x179   : > { %v932_v39 = vpack.c.bf16 (!%p428_p11), %v439_v38, %v438_v36  ;;  %v935_v42 = vpack.c.bf16 (!%p428_p11), %v441_v41, %v440_v40  ;;  %v442_v43 = vld [vmem:[%s1455_s23 + $0x30] sm:$0xff] (!%p428_p11)  ;;  %v443_v44 = vld [vmem:[%s1455_s23 + $0x38] sm:$0xff] (!%p428_p11)  ;;  %v444_v46 = vld [vmem:[%s1455_s23 + $0x40] sm:$0xff] (!%p428_p11) }
 0x17a   : > { %930 = vmatpush3.bf16.msra.mxu0 (!%p428_p11), %v929_v37  ;;  %v938_v45 = vpack.c.bf16 (!%p428_p11), %v443_v44, %v442_v43  ;;  %v445_v47 = vld [vmem:[%s1455_s23 + $0x48] sm:$0xff] (!%p428_p11)  ;;  %v446_v49 = vld [vmem:[%s1455_s23 + $0x50] sm:$0xff] (!%p428_p11)  ;;  %v447_v50 = vld [vmem:[%s1455_s23 + $0x58] sm:$0xff] (!%p428_p11) }
 0x17b   : > { %931 = vmatprep.subr.bf16.mxu0 (!%p428_p11), %v1246_v32  ;;  %v941_v48 = vpack.c.bf16 (!%p428_p11), %v445_v47, %v444_v46  ;;  %v944_v51 = vpack.c.bf16 (!%p428_p11), %v447_v50, %v446_v49  ;;  %v448_v52 = vld [vmem:[%s1455_s23 + $0x60] sm:$0xff] (!%p428_p11)  ;;  %v449_v53 = vld [vmem:[%s1455_s23 + $0x68] sm:$0xff] (!%p428_p11)  ;;  %v450_v55 = vld [vmem:[%s1455_s23 + $0x70] sm:$0xff] (!%p428_p11) }
 0x17c   : > { %v947_v54 = vpack.c.bf16 %v449_v53, %v448_v52  ;;  %v451_v56 = vld [vmem:[%s1455_s23 + $0x78] sm:$0xff]  ;;  %v432_v58 = vld [vmem:[#allocation2] sm:$0xff] }
 0x17d   : > { %v950_v57 = vpack.c.bf16 %v451_v56, %v450_v55  ;;  %v741_v59 = vld [vmem:[%s452_s29] ss:$0 sm:$0xff] }
 0x17e   : > { %933 = vmatpush3.bf16.msra.mxu0 %v932_v39 }
 0x17f   : > { %934 = vmatprep.subr.bf16.mxu0 %v1246_v32 }
 0x182   : > { %936 = vmatpush3.bf16.msra.mxu0 %v935_v42 }
 0x183   : > { %937 = vmatprep.subr.bf16.mxu0 %v1246_v32 }
 0x186   : > { %939 = vmatpush3.bf16.msra.mxu0 %v938_v45 }
 0x187   : > { %940 = vmatprep.subr.bf16.mxu0 %v1246_v32 }
 0x18a   : > { %942 = vmatpush3.bf16.msra.mxu0 %v941_v48 }
 0x18b   : > { %943 = vmatprep.subr.bf16.mxu0 %v1246_v32 }
 0x18e   : > { %945 = vmatpush3.bf16.msra.mxu0 %v944_v51 }
 0x18f   : > { %946 = vmatprep.subr.bf16.mxu0 %v1246_v32 }
 0x192   : > { %948 = vmatpush3.bf16.msra.mxu0 %v947_v54 }
 0x193   : > { %949 = vmatprep.subr.bf16.mxu0 %v1246_v32 }
 0x196   : > { %951 = vmatpush3.bf16.msra.mxu0 %v950_v57 }
 0x199   : > { %867 = vmatmul.mubr.f32.vlgmr.msra.gmra.mrb[0].mxu0 %v432_v58 }
 0x26c   : > { %v526_v60 = vpop.f32.mrb[0].mxu0 }
 0x26d   : > { %v527_v61 = vadd.f32 %v741_v59, %v526_v60  ;;  %v868_v62 = vpop.f32.mrb[1].mxu0 }
 0x26f   : > { %v530_v63 = vmax.f32 %v527_v61, 0.0 }
 0x271   : > { %v531_v0 = vadd.f32 %v530_v63, %v432_v58 }
 0x273   : > { %532 = vst [vmem:[#allocation2] sm:$0xff] %v531_v0 }
 0x274 PF: > { %p742_p12 = scmp.ne.s32.totalorder %s1227_s24, 3 }
 0x275   : > { %v538_v1 = vld [vmem:[#allocation9] sm:$0xff] (!%p742_p12)  ;;  %v539_v2 = vld [vmem:[#allocation9 + $0x8] sm:$0xff] (!%p742_p12)  ;;  %v540_v3 = vld [vmem:[#allocation9 + $0x10] sm:$0xff] (!%p742_p12)  ;;  %v1249_v4 = vmov (!%p742_p12), 0.0|0.0   ;;  %vm1250_vm2 = vmmov (!%p742_p12), 0   ;;  %v1251_v7 = vmov (!%p742_p12), 0.0  }
 0x276   : > { %536 = sbr.rel (%p742_p12) target bundleno = 880 (0x370), region = 76  ;;  %952 = vmatprep.subr.bf16.mxu0 (!%p742_p12), %v1249_v4  ;;  %v953_v5 = vpack.c.bf16 (!%p742_p12), %v539_v2, %v538_v1  ;;  %v541_v6 = vld [vmem:[#allocation9 + $0x18] sm:$0xff] (!%p742_p12)  ;;  %901 = vmatprep.mubr.msk.f32.mxu0 (!%p742_p12), %vm1250_vm2, %v1251_v7  ;;  %v542_v9 = vld [vmem:[#allocation9 + $0x20] sm:$0xff] (!%p742_p12)  ;;  %v543_v10 = vld [vmem:[#allocation9 + $0x28] sm:$0xff] (!%p742_p12) }
 0x277   : > { %v956_v8 = vpack.c.bf16 (!%p742_p12), %v541_v6, %v540_v3  ;;  %v959_v11 = vpack.c.bf16 (!%p742_p12), %v543_v10, %v542_v9  ;;  %v544_v12 = vld [vmem:[#allocation9 + $0x30] sm:$0xff] (!%p742_p12)  ;;  %v545_v13 = vld [vmem:[#allocation9 + $0x38] sm:$0xff] (!%p742_p12)  ;;  %v546_v15 = vld [vmem:[#allocation9 + $0x40] sm:$0xff] (!%p742_p12) }
 0x278   : > { %954 = vmatpush3.bf16.msra.mxu0 (!%p742_p12), %v953_v5  ;;  %v962_v14 = vpack.c.bf16 (!%p742_p12), %v545_v13, %v544_v12  ;;  %v547_v16 = vld [vmem:[#allocation9 + $0x48] sm:$0xff] (!%p742_p12)  ;;  %v548_v18 = vld [vmem:[#allocation9 + $0x50] sm:$0xff] (!%p742_p12)  ;;  %v549_v19 = vld [vmem:[#allocation9 + $0x58] sm:$0xff] (!%p742_p12) }
 0x279   : > { %955 = vmatprep.subr.bf16.mxu0 (!%p742_p12), %v1249_v4  ;;  %v965_v17 = vpack.c.bf16 (!%p742_p12), %v547_v16, %v546_v15  ;;  %v968_v20 = vpack.c.bf16 (!%p742_p12), %v549_v19, %v548_v18  ;;  %v550_v21 = vld [vmem:[#allocation9 + $0x60] sm:$0xff] (!%p742_p12)  ;;  %v551_v22 = vld [vmem:[#allocation9 + $0x68] sm:$0xff] (!%p742_p12)  ;;  %v552_v24 = vld [vmem:[#allocation9 + $0x70] sm:$0xff] (!%p742_p12) }
 0x27a   : > { %v971_v23 = vpack.c.bf16 (!%p742_p12), %v551_v22, %v550_v21  ;;  %v553_v25 = vld [vmem:[#allocation9 + $0x78] sm:$0xff] (!%p742_p12)  ;;  %v537_v27 = vld [vmem:[#allocation2] sm:$0xff] (!%p742_p12) }
 0x27b   : > { %v974_v26 = vpack.c.bf16 (!%p742_p12), %v553_v25, %v552_v24  ;;  %v743_v28 = vld [vmem:[%s1525_s6] ss:$0 sm:$0xff] (!%p742_p12) }
 0x27c   : > { %957 = vmatpush3.bf16.msra.mxu0 (!%p742_p12), %v956_v8 }
 0x27d   : > { %958 = vmatprep.subr.bf16.mxu0 %v1249_v4 }
 0x280   : > { %960 = vmatpush3.bf16.msra.mxu0 %v959_v11 }
 0x281   : > { %961 = vmatprep.subr.bf16.mxu0 %v1249_v4 }
 0x284   : > { %963 = vmatpush3.bf16.msra.mxu0 %v962_v14 }
 0x285   : > { %964 = vmatprep.subr.bf16.mxu0 %v1249_v4 }
 0x288   : > { %966 = vmatpush3.bf16.msra.mxu0 %v965_v17 }
 0x289   : > { %967 = vmatprep.subr.bf16.mxu0 %v1249_v4 }
 0x28c   : > { %969 = vmatpush3.bf16.msra.mxu0 %v968_v20 }
 0x28d   : > { %970 = vmatprep.subr.bf16.mxu0 %v1249_v4 }
 0x290   : > { %972 = vmatpush3.bf16.msra.mxu0 %v971_v23 }
 0x291   : > { %973 = vmatprep.subr.bf16.mxu0 %v1249_v4 }
 0x294   : > { %975 = vmatpush3.bf16.msra.mxu0 %v974_v26 }
 0x297   : > { %902 = vmatmul.mubr.f32.vlgmr.msra.gmra.mrb[0].mxu0 %v537_v27 }
 0x36a   : > { %v627_v29 = vpop.f32.mrb[0].mxu0 }
 0x36b   : > { %v628_v30 = vadd.f32 %v743_v28, %v627_v29  ;;  %v903_v31 = vpop.f32.mrb[1].mxu0 }
 0x36d   : > { %v631_v32 = vmax.f32 %v628_v30, 0.0 }
 0x36f   : > { %632 = vst [vmem:[#allocation11] sm:$0xff] %v631_v32 }
 0x370 PF: > { %s1538_s14 = sadd.s32 4294967295, %s1235_s26   ;;  %s1252_s18 = smov [#allocation11]  }
 0x371   : > { %p1484_p13 = scmp.eq.s32.totalorder %s1538_s14, 3  ;;  %s642_s20 = sshll.u32 %s1252_s18, 4  ;;  %s643_s20 = int_to_ptr.vmem [resolvable:$true] %s642_s20 }
 0x372   : > { %s1171_s21 = scalar_lea.vmem %s643_s20, 128  ;;  %p1178_p4 = scmp.lt.s32.totalorder %s643_s20, %s643_s20 }
 0x373   : > { %p1172_p6 = scmp.ne.s32.totalorder %s643_s20, %s1171_s21  ;;  %p1179_p7 = scmp.lt.s32.totalorder %s1171_s21, %s1171_s21 }
 0x375   : > { %p1173_p0 = pnand %p1172_p6, %p1484_p13  ;;  %p1180_p9 = por %p1179_p7, %p1178_p4 }
 0x377   : > { %p1174_p1 = pneg %p1173_p0 }
 0x379   : > { %p1181_p3 = pnand %p1180_p9, %p1174_p1 }
 0x37b   : > { %1184 = shalt.err (!%p1181_p3)
}
 0x37c   : > { %s1185_s11 = scalar_lea.hbm %s1526_s7, 128 }
 0x37d   : > { %p1186_p8 = scmp.ne.s32.totalorder %s1526_s7, %s1185_s11  ;;  %p1191_p10 = scmp.lt.u32.totalorder %s1185_s11, %s1526_s7 }
 0x37f   : > { %p1187_p5 = pnand %p1186_p8, %p1484_p13 }
 0x381   : > { %p1188_p2 = pneg %p1187_p5 }
 0x383   : > { %p1193_p11 = pnand %p1191_p10, %p1188_p2 }
 0x385   : > { %1196 = shalt.err (!%p1193_p11)
}
 0x386   : > { %993 = dma.vmem_to_hbm [thread:$0]  (%p1484_p13), %s643_s20, 128, %s1526_s7, [#allocation5]  }
 0x387   : > { %1222 = dma.done.wait (%p1484_p13), [#allocation5], 128  }
 0x388   : > { %1224 = vsyncadd (%p1484_p13), [#allocation5], 4294967168 }
 0x389 PF: > { %s21_s26 = sadd.s32 1, %s1235_s26   ;;  %s1540_s24 = smov %s1231_s25 }
 0x38a   : > { %p18_p12 = scmp.ge.s32.totalorder %s21_s26, 6   ;;  %s1541_s25 = smov %s1543_s10 }
 0x38c   :  { %20 = sbr.rel (!%p18_p12) target bundleno = 5 (0x5), region = 105 }
 0x393   :  { %655 = vsyncpa [#allocation4], 1 }
 0x394   :  { %657 = vsyncpa [#allocation4 + $0x1], 1 }
 0x395   :  { %658 = vsyncpa [#allocation7], 1 }
 0x396   :  { %659 = vsyncpa [#allocation10], 1 }
 0x397   :  { %660 = vsyncpa [#allocation5], 1 }
 0x398   :  { %662 = vsyncpa [#allocation5 + $0x1], 1 }

</bundles_post_ra>
